<compile_context>
chip_gen: v7x
topology: tpu7x:2x2x1
jax: 0.10.0
libtpu: 0.0.40
codegen_flags: <defaults>
</compile_context>

<pallas_src>
import functools
import math

import jax
import jax.numpy as jnp
from jax import lax
from jax.experimental import pallas as pl
from jax.experimental.pallas import tpu as pltpu

# StateSE2Index layout: (X, Y, HEADING), size 3.
SE2_SIZE = 3
HEADING_IDX = 2

_LANE = 128
_SUBLANE = 8
_MAX_TILE_N = 4096     # rows / grid step; see VMEM budget in the header comment
_SPLIT_THRESHOLD = 256  # below this, a single grid step beats splitting for the 2nd v7x TC


def _round_up(x, m):
    return ((x + m - 1) // m) * m


def _traj_mlp_kernel(x_ref, w1_ref, b1_ref, w2_ref, b2_ref, o_ref):
    # x_ref:  (tile_n, d_model)   bf16    w1_ref: (d_model, d_ffn_p) bf16
    # b1_ref: (1, d_ffn_p)        f32     w2_ref: (d_ffn_p, out_dim) bf16
    # b2_ref: (1, out_dim)        f32     o_ref:  (tile_n, out_dim)  f32
    h = jnp.dot(x_ref[...], w1_ref[...], preferred_element_type=jnp.float32)
    h = jnp.maximum(h + b1_ref[...], 0.0)          # bias + ReLU in f32 (v5e has no bf16 VPU)
    y = jnp.dot(h.astype(w2_ref.dtype), w2_ref[...],
                preferred_element_type=jnp.float32) + b2_ref[...]

    # Fused heading transform: lanes {3k+2} -> tanh(.) * pi (EUP slot, ~free next to MXU/DMA).
    lane = lax.broadcasted_iota(jnp.int32, y.shape, 1)
    is_heading = (lane % SE2_SIZE) == HEADING_IDX
    y = jnp.where(is_heading, jnp.tanh(y) * jnp.float32(math.pi), y)

    o_ref[...] = y.astype(o_ref.dtype)             # trimmed (tile_n, num_poses*3) store


def trajectory_head_forward(object_queries, kernel_params, *, num_poses, tile_n=None):
    """Pallas implementation of TrajectoryHead.forward.

    object_queries: (..., d_model) float
    kernel_params:  output of pad_params_for_kernel()
    returns: {'trajectory': (-1, num_poses, 3)} float32
    """
    w1 = kernel_params["w1"]
    b1 = kernel_params["b1"]
    w2 = kernel_params["w2"]
    b2 = kernel_params["b2"]
    d_model, d_ffn_p = w1.shape
    out_dim = w2.shape[1]
    assert out_dim == num_poses * SE2_SIZE, (out_dim, num_poses)
    assert d_ffn_p % _LANE == 0, "params must come from pad_params_for_kernel()"

    # MXU operands in the weights' dtype (bf16 by default); accumulation stays f32.
    x = object_queries.reshape(-1, d_model).astype(w1.dtype)
    n = x.shape[0]

    # Row tiling: sublane-aligned tiles; ragged N handled by zero-pad + slice.
    n_min = _round_up(max(n, 1), _SUBLANE)
    if tile_n is None:
        if n_min <= _SPLIT_THRESHOLD:
            tile_n = n_min                       # single cheap step (demo-sized N)
        else:
            # >=2 grid steps so the "parallel" axis shards across v7x's two TCs.
            tile_n = min(_MAX_TILE_N, _round_up(-(-n_min // 2), _SUBLANE))
    tile_n = max(_SUBLANE, _round_up(tile_n, _SUBLANE))
    n_pad = _round_up(n_min, tile_n)
    if n_pad != n:
        x = jnp.pad(x, ((0, n_pad - n), (0, 0)))  # zero rows: safe under relu/tanh

    grid = (n_pad // tile_n,)

    out = pl.pallas_call(
        _traj_mlp_kernel,
        out_shape=jax.ShapeDtypeStruct((n_pad, out_dim), jnp.float32),
        grid_spec=pl.GridSpec(
            grid=grid,
            in_specs=[
                pl.BlockSpec((tile_n, d_model), lambda i: (i, 0)),    # x tile (pipelined)
                pl.BlockSpec((d_model, d_ffn_p), lambda i: (0, 0)),   # W1 (resident)
                pl.BlockSpec((1, d_ffn_p), lambda i: (0, 0)),         # b1
                pl.BlockSpec((d_ffn_p, out_dim), lambda i: (0, 0)),   # W2 (resident)
                pl.BlockSpec((1, out_dim), lambda i: (0, 0)),         # b2
            ],
            # Last block dim == full array dim (out_dim) -> legal and trims HBM writes ~5x.
            out_specs=pl.BlockSpec((tile_n, out_dim), lambda i: (i, 0)),
        ),
        compiler_params=pltpu.CompilerParams(
            dimension_semantics=("parallel",),  # row axis shards across v7x's 2 TCs
        ),
    )(x, w1, b1, w2, b2)

    poses = out[:n].reshape(-1, num_poses, SE2_SIZE)
    return {"trajectory": poses}


def init_trajectory_head_params(key, d_model, d_ffn, num_poses):
    """Logical (unpadded) params, PyTorch nn.Linear-style init, stored as (in, out)."""
    out_dim = num_poses * SE2_SIZE
    k1, k2, k3, k4 = jax.random.split(key, 4)
    bound1 = 1.0 / math.sqrt(d_model)
    bound2 = 1.0 / math.sqrt(d_ffn)
    return {
        "w1": jax.random.uniform(k1, (d_model, d_ffn), jnp.float32, -bound1, bound1),
        "b1": jax.random.uniform(k2, (d_ffn,), jnp.float32, -bound1, bound1),
        "w2": jax.random.uniform(k3, (d_ffn, out_dim), jnp.float32, -bound2, bound2),
        "b2": jax.random.uniform(k4, (out_dim,), jnp.float32, -bound2, bound2),
    }


def pad_params_for_kernel(params, *, matmul_dtype=jnp.bfloat16):
    """Prep logical params for the kernel:
      * zero-pad d_ffn to a multiple of 128 (lane-dense hidden dim; exact),
      * cast the matmul operands (W1, W2) to bf16 (f32 MXU accumulation in-kernel),
      * keep biases in f32 (added post-accumulation on the VPU),
      * leave the output dim UNPADDED (trimmed HBM writeback).
    Pass matmul_dtype=jnp.float32 for a bit-closer (slower) path."""
    w1, b1, w2, b2 = params["w1"], params["b1"], params["w2"], params["b2"]
    d_ffn, out_dim = w2.shape
    d_ffn_p = _round_up(d_ffn, _LANE)
    return {
        "w1": jnp.pad(w1, ((0, 0), (0, d_ffn_p - d_ffn))).astype(matmul_dtype),
        "b1": jnp.pad(b1, (0, d_ffn_p - d_ffn)).reshape(1, d_ffn_p).astype(jnp.float32),
        "w2": jnp.pad(w2, ((0, d_ffn_p - d_ffn), (0, 0))).astype(matmul_dtype),
        "b2": b2.reshape(1, out_dim).astype(jnp.float32),
    }


def _reference_forward(object_queries, params, num_poses):
    x = object_queries.reshape(-1, params["w1"].shape[0]).astype(jnp.float32)
    h = jnp.maximum(x @ params["w1"] + params["b1"], 0.0)
    y = h @ params["w2"] + params["b2"]
    poses = y.reshape(-1, num_poses, SE2_SIZE)
    heading = jnp.tanh(poses[..., HEADING_IDX]) * math.pi
    return poses.at[..., HEADING_IDX].set(heading)


if __name__ == "__main__":
    # Small shapes consistent with TrajectoryHead(num_poses=8, d_ffn=64, d_model=32)
    batch, num_poses, d_model, d_ffn = 2, 8, 32, 64

    key = jax.random.PRNGKey(0)
    k_params, k_input = jax.random.split(key)

    params = init_trajectory_head_params(k_params, d_model, d_ffn, num_poses)
    kernel_params = pad_params_for_kernel(params)           # bf16 matmul operands
    object_queries = jax.random.normal(k_input, (batch, d_model), jnp.float32)

    fwd = jax.jit(functools.partial(trajectory_head_forward, num_poses=num_poses))
    out = fwd(object_queries, kernel_params)
    poses = jax.block_until_ready(out["trajectory"])

    ref = _reference_forward(object_queries, params, num_poses)
    assert poses.shape == (batch, num_poses, SE2_SIZE), poses.shape
    # bf16 MXU operands vs f32 reference: tolerance loosened accordingly.
    assert jnp.allclose(poses, ref, atol=2e-2, rtol=2e-2), "mismatch vs reference"

    print("KERNEL_OK")
</pallas_src>

<mosaic_0001>
module attributes {stable_mosaic.version = 11 : i64} {
  func.func @_traj_mlp_kernel(%arg0: i32, %arg1: memref<8x32xbf16, #tpu.memory_space<vmem>>, %arg2: memref<32x128xbf16, #tpu.memory_space<vmem>>, %arg3: memref<1x128xf32, #tpu.memory_space<vmem>>, %arg4: memref<128x24xbf16, #tpu.memory_space<vmem>>, %arg5: memref<1x24xf32, #tpu.memory_space<vmem>>, %arg6: memref<8x24xf32, #tpu.memory_space<vmem>>) attributes {dimension_semantics = [#tpu.dimension_semantics<parallel>], iteration_bounds = array<i64: 1>, scalar_prefetch = 0 : i64, scratch_operands = 0 : i64, tpu.core_type = #tpu.core_type<tc>, window_params = [{transform_indices = @transform_0, window_bounds = array<i64: 8, 32>}, {pipeline_mode = #tpu.pipeline_mode<synchronous>, transform_indices = @transform_1, window_bounds = array<i64: 32, 128>}, {pipeline_mode = #tpu.pipeline_mode<synchronous>, transform_indices = @transform_2, window_bounds = array<i64: 1, 128>}, {pipeline_mode = #tpu.pipeline_mode<synchronous>, transform_indices = @transform_3, window_bounds = array<i64: 128, 24>}, {pipeline_mode = #tpu.pipeline_mode<synchronous>, transform_indices = @transform_4, window_bounds = array<i64: 1, 24>}, {transform_indices = @transform_5, window_bounds = array<i64: 8, 24>}]} {
    %c0 = arith.constant 0 : index
    %c0_0 = arith.constant 0 : index
    %0 = vector.load %arg1[%c0, %c0_0] : memref<8x32xbf16, #tpu.memory_space<vmem>>, vector<8x32xbf16>
    %c0_1 = arith.constant 0 : index
    %c0_2 = arith.constant 0 : index
    %1 = vector.load %arg2[%c0_1, %c0_2] : memref<32x128xbf16, #tpu.memory_space<vmem>>, vector<32x128xbf16>
    %cst = arith.constant dense<0.000000e+00> : vector<8x128xf32>
    %2 = tpu.matmul %0, %1, %cst {dimension_numbers = #tpu.dot_dimension_numbers<[1], [0], [0], [1], [0, 0, 1, 1], [], []>} : vector<8x32xbf16>, vector<32x128xbf16>, vector<8x128xf32> -> vector<8x128xf32>
    %c0_3 = arith.constant 0 : index
    %c0_4 = arith.constant 0 : index
    %3 = vector.load %arg3[%c0_3, %c0_4] : memref<1x128xf32, #tpu.memory_space<vmem>>, vector<1x128xf32>
    %4 = vector.broadcast %3 : vector<1x128xf32> to vector<8x128xf32>
    %5 = arith.addf %2, %4 : vector<8x128xf32>
    %cst_5 = arith.constant 0.000000e+00 : f32
    %6 = vector.broadcast %cst_5 : f32 to vector<8x128xf32>
    %7 = arith.maximumf %5, %6 : vector<8x128xf32>
    %8 = arith.truncf %7 : vector<8x128xf32> to vector<8x128xbf16>
    %c0_6 = arith.constant 0 : index
    %c0_7 = arith.constant 0 : index
    %9 = vector.load %arg4[%c0_6, %c0_7] : memref<128x24xbf16, #tpu.memory_space<vmem>>, vector<128x24xbf16>
    %cst_8 = arith.constant dense<0.000000e+00> : vector<8x24xf32>
    %10 = tpu.matmul %8, %9, %cst_8 {dimension_numbers = #tpu.dot_dimension_numbers<[1], [0], [0], [1], [0, 0, 1, 1], [], []>} : vector<8x128xbf16>, vector<128x24xbf16>, vector<8x24xf32> -> vector<8x24xf32>
    %c0_9 = arith.constant 0 : index
    %c0_10 = arith.constant 0 : index
    %11 = vector.load %arg5[%c0_9, %c0_10] : memref<1x24xf32, #tpu.memory_space<vmem>>, vector<1x24xf32>
    %12 = vector.broadcast %11 : vector<1x24xf32> to vector<8x24xf32>
    %13 = arith.addf %10, %12 : vector<8x24xf32>
    %14 = tpu.iota {dimensions = array<i32: 1>} : vector<8x24xi32>
    %c3_i32 = arith.constant 3 : i32
    %c0_i32 = arith.constant 0 : i32
    %15 = arith.cmpi eq, %c3_i32, %c0_i32 : i32
    %c1_i32 = arith.constant 1 : i32
    %16 = arith.select %15, %c1_i32, %c3_i32 : i32
    %17 = vector.broadcast %16 : i32 to vector<8x24xi32>
    %18 = arith.remsi %14, %17 : vector<8x24xi32>
    %c0_i32_11 = arith.constant 0 : i32
    %19 = vector.broadcast %c0_i32_11 : i32 to vector<8x24xi32>
    %20 = arith.cmpi ne, %18, %19 : vector<8x24xi32>
    %c0_i32_12 = arith.constant 0 : i32
    %21 = vector.broadcast %c0_i32_12 : i32 to vector<8x24xi32>
    %22 = arith.cmpi slt, %18, %21 : vector<8x24xi32>
    %c0_i32_13 = arith.constant 0 : i32
    %23 = arith.cmpi slt, %16, %c0_i32_13 : i32
    %24 = vector.broadcast %23 : i1 to vector<8x24xi1>
    %25 = vector.broadcast %24 : vector<8x24xi1> to vector<8x24xi1>
    %26 = arith.xori %22, %25 : vector<8x24xi1>
    %27 = arith.andi %26, %20 : vector<8x24xi1>
    %28 = vector.broadcast %16 : i32 to vector<8x24xi32>
    %29 = arith.addi %18, %28 : vector<8x24xi32>
    %30 = arith.select %27, %29, %18 : vector<8x24xi1>, vector<8x24xi32>
    %c2_i32 = arith.constant 2 : i32
    %31 = vector.broadcast %c2_i32 : i32 to vector<8x24xi32>
    %32 = arith.cmpi eq, %30, %31 : vector<8x24xi32>
    %33 = math.tanh %13 : vector<8x24xf32>
    %cst_14 = arith.constant 3.14159274 : f32
    %34 = vector.broadcast %cst_14 : f32 to vector<8x24xf32>
    %35 = arith.mulf %33, %34 : vector<8x24xf32>
    %36 = arith.select %32, %35, %13 : vector<8x24xi1>, vector<8x24xf32>
    %c0_15 = arith.constant 0 : index
    %c0_16 = arith.constant 0 : index
    %37 = vector.load %arg6[%c0_15, %c0_16] : memref<8x24xf32, #tpu.memory_space<vmem>>, vector<8x24xf32>
    tpu.vector_store %arg6[%c0_15, %c0_16], %36 {strides = array<i32>} : memref<8x24xf32, #tpu.memory_space<vmem>>, vector<8x24xf32>,
    return
  }
  func.func @transform_0(%arg0: i32) -> (i32, i32) {
    %c0_i32 = arith.constant 0 : i32
    %c0_i32_0 = arith.constant 0 : i32
    return %arg0, %c0_i32 : i32, i32
  }
  func.func @transform_1(%arg0: i32) -> (i32, i32) {
    %c0_i32 = arith.constant 0 : i32
    %c0_i32_0 = arith.constant 0 : i32
    %c0_i32_1 = arith.constant 0 : i32
    return %c0_i32, %c0_i32_0 : i32, i32
  }
  func.func @transform_2(%arg0: i32) -> (i32, i32) {
    %c0_i32 = arith.constant 0 : i32
    %c0_i32_0 = arith.constant 0 : i32
    %c0_i32_1 = arith.constant 0 : i32
    return %c0_i32, %c0_i32_0 : i32, i32
  }
  func.func @transform_3(%arg0: i32) -> (i32, i32) {
    %c0_i32 = arith.constant 0 : i32
    %c0_i32_0 = arith.constant 0 : i32
    %c0_i32_1 = arith.constant 0 : i32
    return %c0_i32, %c0_i32_0 : i32, i32
  }
  func.func @transform_4(%arg0: i32) -> (i32, i32) {
    %c0_i32 = arith.constant 0 : i32
    %c0_i32_0 = arith.constant 0 : i32
    %c0_i32_1 = arith.constant 0 : i32
    return %c0_i32, %c0_i32_0 : i32, i32
  }
  func.func @transform_5(%arg0: i32) -> (i32, i32) {
    %c0_i32 = arith.constant 0 : i32
    %c0_i32_0 = arith.constant 0 : i32
    return %arg0, %c0_i32 : i32, i32
  }
}

</mosaic_0001>

<bundles_post_ra>
// kernel: trajectory_head_forward.1
= control target key start
LH: loop header
LB: loop body
LE: loop exit
PB: predicated region body
PF: predicated region fallthrough
CT: control target
= control target key end

     0   :  { %v299_v0 = vmov 0.0   ;;  %vm300_vm0 = vmmov 0   ;;  %vm45_vm1 = vcmask 261120   ;;  %v202_v20 = vlaneseq  ;;  %s377_s1 = inlined_call_operand.vmem [shape: bf16[32,128], index: 1, kind: input, shape index: {}]   ;;  %s378_s3 = inlined_call_operand.vmem [shape: bf16[128,24], index: 3, kind: input, shape index: {}]   ;;  %s379_s0 = inlined_call_operand.vmem [shape: bf16[8,32], index: 0, kind: input, shape index: {}]   ;;  %s380_s2 = inlined_call_operand.vmem [shape: f32[1,128], index: 2, kind: input, shape index: {}]   ;;  %s381_s4 = inlined_call_operand.vmem [shape: f32[1,24], index: 4, kind: input, shape index: {}]   ;;  %s382_s5 = inlined_call_operand.vmem [shape: f32[8,24], index: 5, kind: output, shape index: {}]  }
   0x1   :  { %255 = vmatprep.subr.bf16.mxu0 %v299_v0  ;;  %v287_v1 = vld [vmem:[%s377_s1] sm:$0xff]   ;;  %259 = vmatprep.mubr.msk.bf16.mxu0 %vm300_vm0, %v299_v0  ;;  %v288_v2 = vld [vmem:[%s377_s1 + $0x8] sm:$0xff]   ;;  %v291_v6 = vld [vmem:[%s378_s3 + $0x10] sm:$0xff]   ;;  %vm224_vm6 = vcmask 195584  }
   0x2   :  { %263 = vmatprep.subr.bf16.mxu1 %v299_v0  ;;  %279 = vmatprep.mubr.msk.bf16.mxu1 %vm300_vm0, %v299_v0  ;;  %v289_v3 = vld [vmem:[%s378_s3] sm:$0xff]   ;;  %v290_v4 = vld [vmem:[%s378_s3 + $0x8] sm:$0xff]   ;;  %v292_v7 = vld [vmem:[%s378_s3 + $0x18] sm:$0xff]   ;;  %v203_v21 = vand.u32 127, %v202_v20 }
   0x3   :  { %256 = vmatpush3.bf16.msra.mxu0 %v287_v1  ;;  %264 = vmatpush3.bf16.msra.mxu1 %v289_v3  ;;  %v21_v5 = vld [vmem:[%s379_s0] sm:$0xf]  ;;  %v294_v9 = vld [vmem:[%s378_s3 + $0x28] sm:$0xff]   ;;  %v295_v10 = vld [vmem:[%s378_s3 + $0x30] sm:$0xff]  }
   0x4   :  { %257 = vmatprep.subr.bf16.mxu0 %v299_v0  ;;  %265 = vmatprep.subr.bf16.mxu1 %v299_v0  ;;  %v293_v8 = vld [vmem:[%s378_s3 + $0x20] sm:$0xff]   ;;  %v296_v11 = vld [vmem:[%s378_s3 + $0x38] sm:$0xff]   ;;  %v367_v22 = vmul.u32.u64.low 2863311531, %v203_v21  ;;  %v368_v23 = vmul.u32.u64.high 2863311531, %v203_v21, %v367_v22 }
   0x5   :  { %v230_v12 = vld [vmem:[%s380_s2] ss:$0 sm:$0xff] }
   0x6   :  { %v210_v24 = vshrl.u32 %v368_v23, 1  ;;  %v234_v26 = vld [vmem:[%s381_s4] ss:$0 sm:$0xff] }
   0x7   :  { %258 = vmatpush3.bf16.msra.mxu0 %v288_v2  ;;  %266 = vmatpush3.bf16.msra.mxu1 %v290_v4 }
   0x8   :  { %267 = vmatprep.subr.bf16.mxu1 %v299_v0  ;;  %v211_v25 = vmul.u32 3, %v210_v24 }
   0xa   :  { %260 = vmatmul.mubr.msk.bf16.vlgmr.msra.gmra.mrb[0].mxu0 %vm45_vm1, %v21_v5  ;;  %v212_v28 = vsub.s32 %v203_v21, %v211_v25 }
   0xb   :  { %268 = vmatpush3.bf16.msra.mxu1 %v291_v6 }
   0xc   :  { %269 = vmatprep.subr.bf16.mxu1 %v299_v0  ;;  %vm215_vm2 = vcmp.ne.s32.totalorder %v212_v28, 0  ;;  %vm216_vm3 = vcmp.lt.s32.totalorder %v212_v28, 0  ;;  %v218_v33 = vadd.s32 3, %v212_v28 }
   0xd   :  { %vm217_vm4 = vmand %vm216_vm3, %vm215_vm2 }
   0xe   :  { %v219_v34 = vsel %vm217_vm4, %v218_v33, %v212_v28 }
   0xf   :  { %270 = vmatpush3.bf16.msra.mxu1 %v292_v7  ;;  %vm220_vm5 = vcmp.eq.s32.totalorder %v219_v34, 2 }
  0x10   :  { %271 = vmatprep.subr.bf16.mxu1 %v299_v0 }
  0x13   :  { %272 = vmatpush3.bf16.msra.mxu1 %v293_v8 }
  0x14   :  { %273 = vmatprep.subr.bf16.mxu1 %v299_v0 }
  0x17   :  { %274 = vmatpush3.bf16.msra.mxu1 %v294_v9 }
  0x18   :  { %275 = vmatprep.subr.bf16.mxu1 %v299_v0 }
  0x1b   :  { %276 = vmatpush3.bf16.msra.mxu1 %v295_v10 }
  0x1c   :  { %277 = vmatprep.subr.bf16.mxu1 %v299_v0 }
  0x1f   :  { %278 = vmatpush3.bf16.msra.mxu1 %v296_v11 }
  0xdd   :  { %v83_v13 = vpop.f32.mrb[0].mxu0 }
  0xde   :  { %v84_v14 = vadd.f32 %v230_v12, %v83_v13  ;;  %v261_v15 = vpop.f32.mrb[1].mxu0 }
  0xdf   :  { %v86_v16 = vpop.f32.mrb[2].mxu0 }
  0xe0   :  { %v89_v17 = vmax.f32 %v84_v14, 0.0  ;;  %v262_v18 = vpop.f32.mrb[3].mxu0 }
  0xe2   :  { %v90_v19 = vpack.c.bf16 %v89_v17, %v89_v17 }
  0xe4   :  { %280 = vmatmul.mubr.bf16.vlgmr.msra.gmra.mrb[0].mxu1 %v90_v19 }
 0x1b7   :  { %v196_v27 = vpop.f32.mrb[0].mxu1 }
 0x1b8   :  { %v197_v29 = vadd.f32 %v234_v26, %v196_v27  ;;  %v281_v30 = vpop.f32.mrb[1].mxu1 }
 0x1b9   :  { %v199_v31 = vpop.f32.mrb[2].mxu1 }
 0x1ba   :  { %297 = vtanh.f32 %v197_v29  ;;  %v282_v32 = vpop.f32.mrb[3].mxu1 }
 0x1c4   :  { %v298_v35 = vpop.eup %297 }
 0x1c5   :  { %v222_v36 = vmul.f32 3.1415927, %v298_v35 }
 0x1c7   :  { %v223_v37 = vsel %vm220_vm5, %v222_v36, %v197_v29 }
 0x1c8   :  { %225 = vst.msk [vmem:[%s382_s5] sm:$0xff] %vm224_vm6, %v223_v37 }

</bundles_post_ra>
